<compile_context>
chip_gen: v7x
topology: tpu7x:2x2x1
jax: 0.10.0
libtpu: 0.0.40
codegen_flags: <defaults>
</compile_context>

<pallas_src>
import functools
import math

import jax
import jax.numpy as jnp
from jax.experimental import pallas as pl
from jax.experimental.pallas import tpu as pltpu


LANE = 128            # lane-dense padded feature width (>= d_out + 2)
NEG_BIG = -1e30       # mask fill value
NEG_THRESH = -1e29    # "row still fully masked" threshold


def _project_kernel(h_ref, wcat_ref, zz_ref, *, mxu_dtype):
    # zz = h @ [W | W@a_src | W@a_dst | 0-pad]   -- computed once per graph.
    h = h_ref[...].astype(mxu_dtype)
    w = wcat_ref[...].astype(mxu_dtype)
    zz_ref[...] = jnp.dot(h, w, preferred_element_type=jnp.float32)


def _attn_kernel(zz_ref, ssrc_ref, sdst_ref, adjT_ref, out_ref,
                 m_sc, l_sc, acc_sc, *, mxu_dtype):
    i = pl.program_id(1)                               # src (reduction) axis

    @pl.when(i == 0)
    def _():
        m_sc[...] = jnp.full_like(m_sc, NEG_BIG)
        l_sc[...] = jnp.zeros_like(l_sc)
        acc_sc[...] = jnp.zeros_like(acc_sc)

    # scores_T[j, i] = leaky_relu(a_dst.z_j + a_src.z_i)     (dst-major)
    scores = sdst_ref[...] + ssrc_ref[...]             # (Td,1)+(1,Ts) -> (Td,Ts)
    scores = jnp.where(scores >= 0.0, scores, 0.01 * scores)   # F.leaky_relu default

    mask = adjT_ref[...] > 0                            # int8 compare, no f32 cast
    masked = jnp.where(mask, scores, NEG_BIG)

    # Online (flash-style) masked softmax over the src axis.
    m_prev = m_sc[...]
    m_new = jnp.maximum(m_prev, jnp.max(masked, axis=-1, keepdims=True))
    m_safe = jnp.where(m_new > NEG_THRESH, m_new, 0.0)  # keep exp finite for 0-indegree rows
    corr = jnp.where(m_prev > NEG_THRESH, jnp.exp(m_prev - m_safe), 0.0)

    p = jnp.exp(masked - m_safe)                         # masked entries underflow to 0
    l_sc[...] = corr * l_sc[...] + jnp.sum(p, axis=-1, keepdims=True)
    acc_sc[...] = corr * acc_sc[...] + jnp.dot(
        p.astype(mxu_dtype), zz_ref[...].astype(mxu_dtype),
        preferred_element_type=jnp.float32)
    m_sc[...] = m_new

    @pl.when(i == pl.num_programs(1) - 1)
    def _():
        denom = l_sc[...]
        safe = jnp.where(denom > 0.0, denom, 1.0)        # 0-indegree rows -> zeros
        r = pl.reciprocal(safe, approx=True)             # EUP
        r = r * (2.0 - safe * r)                         # one Newton step -> keeps 1e-4
        out_ref[...] = (acc_sc[...] * r).astype(out_ref.dtype)


def gat_layer(h, w_fc_t, a_src, a_dst, adj, *, dst_tile=None, src_tile=None,
              mxu_dtype=jnp.float32):
    """h: (N, Din) f32, w_fc_t: (Din, Dout), a_src/a_dst: (Dout, 1),
    adj: (N, N), adj[i, j] != 0 iff edge i -> j (structural / unweighted)."""
    N, d_in = h.shape
    d_out = w_fc_t.shape[1]
    assert d_out + 2 <= LANE

    # Tiling: small graphs run in one grid step; large graphs tile both axes.
    if dst_tile is None:
        dst_tile = N if N <= 512 else 256
    if src_tile is None:
        src_tile = N if N <= 1024 else 512
    dst_tile = min(dst_tile, N)
    src_tile = min(src_tile, N)
    assert N % dst_tile == 0 and N % src_tile == 0
    assert dst_tile == N or dst_tile % 32 == 0      # int8 adjT sublane alignment
    assert src_tile == N or src_tile % 128 == 0     # lane alignment

    # Fused, lane-dense weights: [W | W@a_src | W@a_dst | zeros] -> one MXU stream.
    w_cat = jnp.zeros((d_in, LANE), jnp.float32)
    w_cat = w_cat.at[:, :d_out].set(w_fc_t.astype(jnp.float32))
    w_cat = w_cat.at[:, d_out].set((w_fc_t @ a_src)[:, 0])
    w_cat = w_cat.at[:, d_out + 1].set((w_fc_t @ a_dst)[:, 0])

    # ---- Pass 1: projection, computed ONCE (hoisted out of the dst-tile loop).
    row_tile = min(N if N <= 1024 else 512, N)
    assert N % row_tile == 0
    zz = pl.pallas_call(
        functools.partial(_project_kernel, mxu_dtype=mxu_dtype),
        out_shape=jax.ShapeDtypeStruct((N, LANE), jnp.float32),
        grid_spec=pltpu.PrefetchScalarGridSpec(
            num_scalar_prefetch=0,
            grid=(N // row_tile,),
            in_specs=[pl.BlockSpec((row_tile, d_in), lambda r: (r, 0)),
                      pl.BlockSpec((d_in, LANE), lambda r: (0, 0))],
            out_specs=pl.BlockSpec((row_tile, LANE), lambda r: (r, 0)),
        ),
        compiler_params=pltpu.CompilerParams(
            dimension_semantics=("parallel",)),
    )(h.astype(jnp.float32), w_cat)

    # Attention score vectors: tiny XLA slices of zz (no in-kernel transpose).
    s_src_row = zz[:, d_out].reshape(1, N)          # (1, N)  a_src . z_i
    s_dst_col = zz[:, d_out + 1].reshape(N, 1)      # (N, 1)  a_dst . z_j

    # dst-major int8 adjacency: adj_t[j, i] != 0 iff edge i -> j.
    adj_t = (adj.T != 0).astype(jnp.int8)

    n_dst = N // dst_tile
    n_src = N // src_tile

    # VMEM budget from actual buffer sizes + headroom (>= 32 MiB scoped default,
    # stays well inside v7x's 64 MiB physical for the default tile sizes).
    est = (2 * src_tile * LANE * 4          # zz blocks (double-buffered)
           + 2 * src_tile * 128 * 4         # s_src row blocks (lane-padded)
           + 2 * dst_tile * 128 * 4         # s_dst col blocks (lane-padded)
           + 2 * dst_tile * src_tile        # adjT int8 blocks
           + 2 * dst_tile * LANE * 4        # output blocks
           + 3 * dst_tile * 128 * 4         # m / l scratch (lane-padded)
           + dst_tile * LANE * 4            # acc scratch
           + 6 * dst_tile * src_tile * 4)   # in-body (Td,Ts) f32 temporaries
    vmem_limit = max(32 * 1024 * 1024, est + 16 * 1024 * 1024)

    # ---- Pass 2: masked online softmax + aggregation, dst "parallel", src "arbitrary".
    out_padded = pl.pallas_call(
        functools.partial(_attn_kernel, mxu_dtype=mxu_dtype),
        out_shape=jax.ShapeDtypeStruct((N, LANE), jnp.float32),
        grid_spec=pltpu.PrefetchScalarGridSpec(
            num_scalar_prefetch=0,
            grid=(n_dst, n_src),
            in_specs=[
                pl.BlockSpec((src_tile, LANE), lambda j, i: (i, 0)),      # z (values)
                pl.BlockSpec((1, src_tile), lambda j, i: (0, i)),         # a_src . z
                pl.BlockSpec((dst_tile, 1), lambda j, i: (j, 0)),         # a_dst . z
                pl.BlockSpec((dst_tile, src_tile), lambda j, i: (j, i)),  # adj^T int8
            ],
            out_specs=pl.BlockSpec((dst_tile, LANE), lambda j, i: (j, 0)),
            scratch_shapes=[
                pltpu.VMEM((dst_tile, 1), jnp.float32),     # running max
                pltpu.VMEM((dst_tile, 1), jnp.float32),     # running denom
                pltpu.VMEM((dst_tile, LANE), jnp.float32),  # running alpha @ z
            ],
        ),
        compiler_params=pltpu.CompilerParams(
            dimension_semantics=("parallel", "arbitrary"),
            vmem_limit_bytes=vmem_limit,
        ),
    )(zz, s_src_row, s_dst_col, adj_t)

    # TODO(synk): consumers that accept the lane-padded (N, 128) layout can skip this slice.
    return out_padded[:, :d_out]


def _reference(h, w_fc_t, a_src, a_dst, adj):
    z = h @ w_fc_t
    scores = (z @ a_src) + (z @ a_dst).T
    scores = jnp.where(scores >= 0.0, scores, 0.01 * scores)
    masked = jnp.where(adj > 0.0, scores, -1e30)
    e = jnp.exp(masked - jnp.max(masked, axis=0, keepdims=True)) * (adj != 0)
    denom = jnp.sum(e, axis=0, keepdims=True)
    alpha = e / jnp.where(denom > 0.0, denom, 1.0)
    return alpha.T @ z


if __name__ == "__main__":
    N, D_IN, D_OUT = 64, 32, 16

    key = jax.random.PRNGKey(0)
    k_h, k_fc, k_attn, k_adj = jax.random.split(key, 4)

    # Node features.
    h = jax.random.normal(k_h, (N, D_IN), dtype=jnp.float32)

    # Parameters: xavier_normal_ with gain = calculate_gain('relu') = sqrt(2).
    gain = math.sqrt(2.0)
    std_fc = gain * math.sqrt(2.0 / (D_IN + D_OUT))
    w_fc = std_fc * jax.random.normal(k_fc, (D_OUT, D_IN), dtype=jnp.float32)
    w_fc_t = w_fc.T  # (Din, Dout) so h @ w_fc_t == fc(h)

    std_attn = gain * math.sqrt(2.0 / (2 * D_OUT + 1))
    w_attn = std_attn * jax.random.normal(k_attn, (1, 2 * D_OUT), dtype=jnp.float32)
    a_src = w_attn[0, :D_OUT].reshape(D_OUT, 1)   # acts on z_src
    a_dst = w_attn[0, D_OUT:].reshape(D_OUT, 1)   # acts on z_dst

    # Random directed graph + self loops so every node has an incoming edge.
    adj = (jax.random.uniform(k_adj, (N, N)) < 0.2).astype(jnp.float32)
    adj = jnp.maximum(adj, jnp.eye(N, dtype=jnp.float32))

    out = gat_layer(h, w_fc_t, a_src, a_dst, adj)
    out = jax.block_until_ready(out)

    ref = _reference(h, w_fc_t, a_src, a_dst, adj)
    assert out.shape == (N, D_OUT)
    assert jnp.allclose(out, ref, atol=1e-4, rtol=1e-4), float(jnp.max(jnp.abs(out - ref)))

    print("KERNEL_OK")
</pallas_src>

<mosaic_0001>
module attributes {stable_mosaic.version = 11 : i64} {
  func.func @_project_kernel(%arg0: i32, %arg1: memref<64x32xf32, #tpu.memory_space<vmem>>, %arg2: memref<32x128xf32, #tpu.memory_space<vmem>>, %arg3: memref<64x128xf32, #tpu.memory_space<vmem>>) attributes {dimension_semantics = [#tpu.dimension_semantics<parallel>], iteration_bounds = array<i64: 1>, scalar_prefetch = 0 : i64, scratch_operands = 0 : i64, tpu.core_type = #tpu.core_type<tc>, window_params = [{transform_indices = @transform_0, window_bounds = array<i64: 64, 32>}, {pipeline_mode = #tpu.pipeline_mode<synchronous>, transform_indices = @transform_1, window_bounds = array<i64: 32, 128>}, {transform_indices = @transform_2, window_bounds = array<i64: 64, 128>}]} {
    %c0 = arith.constant 0 : index
    %c0_0 = arith.constant 0 : index
    %0 = vector.load %arg1[%c0, %c0_0] : memref<64x32xf32, #tpu.memory_space<vmem>>, vector<64x32xf32>
    %c0_1 = arith.constant 0 : index
    %c0_2 = arith.constant 0 : index
    %1 = vector.load %arg2[%c0_1, %c0_2] : memref<32x128xf32, #tpu.memory_space<vmem>>, vector<32x128xf32>
    %cst = arith.constant dense<0.000000e+00> : vector<64x128xf32>
    %2 = tpu.matmul %0, %1, %cst {dimension_numbers = #tpu.dot_dimension_numbers<[1], [0], [0], [1], [0, 0, 1, 1], [], []>} : vector<64x32xf32>, vector<32x128xf32>, vector<64x128xf32> -> vector<64x128xf32>
    %c0_3 = arith.constant 0 : index
    %c0_4 = arith.constant 0 : index
    %3 = vector.load %arg3[%c0_3, %c0_4] : memref<64x128xf32, #tpu.memory_space<vmem>>, vector<64x128xf32>
    tpu.vector_store %arg3[%c0_3, %c0_4], %2 {strides = array<i32>} : memref<64x128xf32, #tpu.memory_space<vmem>>, vector<64x128xf32>,
    return
  }
  func.func @transform_0(%arg0: i32) -> (i32, i32) {
    %c0_i32 = arith.constant 0 : i32
    %c0_i32_0 = arith.constant 0 : i32
    return %arg0, %c0_i32 : i32, i32
  }
  func.func @transform_1(%arg0: i32) -> (i32, i32) {
    %c0_i32 = arith.constant 0 : i32
    %c0_i32_0 = arith.constant 0 : i32
    %c0_i32_1 = arith.constant 0 : i32
    return %c0_i32, %c0_i32_0 : i32, i32
  }
  func.func @transform_2(%arg0: i32) -> (i32, i32) {
    %c0_i32 = arith.constant 0 : i32
    %c0_i32_0 = arith.constant 0 : i32
    return %arg0, %c0_i32 : i32, i32
  }
}

</mosaic_0001>

<bundles_post_ra>
// kernel: tpu_custom_call.1
= control target key start
LH: loop header
LB: loop body
LE: loop exit
PB: predicated region body
PF: predicated region fallthrough
CT: control target
= control target key end

     0   :  { %vm24_vm0 = vcmask 261120   ;;  %s331_s0 = inlined_call_operand.vmem [shape: f32[64,32], index: 0, kind: input, shape index: {}]   ;;  %s332_s1 = inlined_call_operand.vmem [shape: f32[32,128], index: 1, kind: input, shape index: {}]   ;;  %s333_s2 = inlined_call_operand.hbm [shape: f32[64,128], index: 2, kind: output, shape index: {}]  }
   0x1   :  { %v20_v0 = vld [vmem:[%s332_s1] sm:$0xff]  ;;  %v21_v1 = vld [vmem:[%s332_s1 + $0x8] sm:$0xff]  ;;  %v22_v2 = vld [vmem:[%s332_s1 + $0x10] sm:$0xff] }
   0x2   :  { %v218_v3 = vpack.c.bf16 %v21_v1, %v20_v0  ;;  %v23_v4 = vld [vmem:[%s332_s1 + $0x18] sm:$0xff]  ;;  %v12_v5 = vld [vmem:[%s331_s0] sm:$0xff] }
   0x3   :  { %v16_v6 = vld [vmem:[%s331_s0 + $0x20] sm:$0xff]  ;;  %v222_v7 = vpack.c.bf16 %v23_v4, %v22_v2  ;;  %206 = vmatprep.mubr.msk.f32.mxu0 %vm24_vm0, %v12_v5 }
   0x4   :  { %212 = vmatprep.mubr.msk.f32.mxu1 %vm24_vm0, %v16_v6  ;;  %219 = vmatprep.subr.bf16.mxu0 %v218_v3 }
   0x5   :  { %226 = vmatprep.subr.bf16.mxu1 %v218_v3  ;;  %221 = vmatpush3.bf16.msra.mxu0 %v218_v3 }
   0x6   :  { %228 = vmatpush3.bf16.msra.mxu1 %v218_v3 }
   0x7   :  { %7 = vsyncpa [#allocation3], 0  ;;  %223 = vmatprep.subr.bf16.mxu0 %v222_v7  ;;  %227 = vmatprep.subr.bf16.mxu1 %v222_v7  ;;  %v13_v8 = vld [vmem:[%s331_s0 + $0x8] sm:$0xff]  ;;  %v14_v10 = vld [vmem:[%s331_s0 + $0x10] sm:$0xff]  ;;  %s257_s4 = smov [#allocation2]  }
   0x8   :  { %v17_v9 = vld [vmem:[%s331_s0 + $0x28] sm:$0xff]  ;;  %v18_v11 = vld [vmem:[%s331_s0 + $0x30] sm:$0xff]  ;;  %v15_v12 = vld [vmem:[%s331_s0 + $0x18] sm:$0xff]  ;;  %s167_s5 = sshll.u32 %s257_s4, 4  ;;  %s168_s5 = int_to_ptr.vmem [resolvable:$true] %s167_s5 }
   0x9   :  { %225 = vmatpush3.bf16.msra.mxu0 %v222_v7  ;;  %v19_v13 = vld [vmem:[%s331_s0 + $0x38] sm:$0xff]  ;;  %s233_s0 = scalar_lea.vmem %s168_s5, 1024  ;;  %p238_p1 = scmp.lt.s32.totalorder %s168_s5, %s168_s5 }
   0xa   :  { %229 = vmatpush3.bf16.msra.mxu1 %v222_v7  ;;  %p234_p0 = scmp.ne.s32.totalorder %s168_s5, %s233_s0  ;;  %p239_p2 = scmp.lt.s32.totalorder %s233_s0, %s233_s0 }
   0xc   :  { %207 = vmatmul.mubr.msk.f32.vlgmr.msra.gmra.mrb[0].mxu0 %vm24_vm0, %v13_v8  ;;  %p240_p3 = por %p239_p2, %p238_p1 }
   0xd   :  { %213 = vmatmul.mubr.msk.f32.vlgmr.msra.gmra.mrb[0].mxu1 %vm24_vm0, %v17_v9  ;;  %209 = vmatprep.mubr.msk.f32.mxu0 %vm24_vm0, %v14_v10 }
   0xe   :  { %215 = vmatprep.mubr.msk.f32.mxu1 %vm24_vm0, %v18_v11  ;;  %p241_p4 = pnand %p240_p3, %p234_p0 }
  0x10   :  { %210 = vmatmul.mubr.msk.f32.gmra.mrb[2].mxu0 %vm24_vm0, %v15_v12 }
  0x11   :  { %216 = vmatmul.mubr.msk.f32.gmra.mrb[2].mxu1 %vm24_vm0, %v19_v13 }
  0xdf   :  { %v208_v14 = vpop.f32.mrb[0].mxu0 }
  0xe0   :  { %v214_v15 = vpop.f32.mrb[0].mxu1  ;;  %155 = vst [vmem:[#allocation2 + $0x8] sm:$0xff] %v208_v14  ;;  %v115_v16 = vpop.f32.mrb[1].mxu0 }
  0xe1   :  { %159 = vst [vmem:[#allocation2 + $0x28] sm:$0xff] %v214_v15  ;;  %v135_v17 = vpop.f32.mrb[1].mxu1  ;;  %154 = vst [vmem:[#allocation2] sm:$0xff] %v115_v16 }
  0xe2   :  { %158 = vst [vmem:[#allocation2 + $0x20] sm:$0xff] %v135_v17 }
  0xe3   :  { %v211_v18 = vpop.f32.mrb[2].mxu0 }
  0xe4   :  { %v217_v19 = vpop.f32.mrb[2].mxu1  ;;  %157 = vst [vmem:[#allocation2 + $0x18] sm:$0xff] %v211_v18  ;;  %v125_v20 = vpop.f32.mrb[3].mxu0 }
  0xe5   :  { %161 = vst [vmem:[#allocation2 + $0x38] sm:$0xff] %v217_v19  ;;  %v145_v21 = vpop.f32.mrb[3].mxu1  ;;  %156 = vst [vmem:[#allocation2 + $0x10] sm:$0xff] %v125_v20 }
  0xe6   :  { %160 = vst [vmem:[#allocation2 + $0x30] sm:$0xff] %v145_v21 }
  0xe7   :  { %244 = shalt.err (!%p241_p4)
}
  0xe8   :  { %s245_s8 = scalar_lea.hbm %s333_s2, 1024 }
  0xe9   :  { %p246_p5 = scmp.ne.s32.totalorder %s333_s2, %s245_s8  ;;  %p249_p6 = scmp.lt.u32.totalorder %s245_s8, %s333_s2 }
  0xeb   :  { %p251_p7 = pnand %p249_p6, %p246_p5 }
  0xed   :  { %254 = shalt.err (!%p251_p7)
}
  0xee   :  { %s258_s13 = smov 128   ;;  %s259_s14 = smov 8  }
  0xef   :  { %173 = dma.vmem_to_hbm [thread:$0]  %s168_s5, 1024, %s333_s2, [#allocation3], %s258_s13, %s258_s13, %s259_s14  }
  0xf0   :  { %255 = dma.done.wait [#allocation3], 1024  }
  0xf1   :  { %256 = vsyncadd [#allocation3], 4294966272 }
  0xf2   :  { %177 = vsyncpa [#allocation3], 1 }

</bundles_post_ra>
